<compile_context>
chip_gen: v7x
topology: tpu7x:2x2x1
jax: 0.10.0
libtpu: 0.0.40
codegen_flags: <defaults>
</compile_context>

<pallas_src>
import functools

import jax
import jax.numpy as jnp
import numpy as np
from jax.experimental import pallas as pl
from jax.experimental.pallas import tpu as pltpu

OUT_LANES = 128  # lane-dense packed output width (one vreg wide)


def _actor_kernel(obs_ref, gumbel_ref, tbl_ref, out_ref, *,
                  inv_temp, deterministic):
    TB = obs_ref.shape[0]
    S, A = tbl_ref.shape

    # ---- per-state logits lookup via one_hot @ table (exact row select) ----
    obs = obs_ref[...]                                               # (TB,1) i32
    state_iota = jax.lax.broadcasted_iota(jnp.int32, (TB, S), 1)
    one_hot = (state_iota == obs).astype(jnp.float32)                # (TB,S)
    logits = jnp.dot(one_hot, tbl_ref[...],
                     preferred_element_type=jnp.float32)             # (TB,A)

    # ---- Categorical(logits): log-softmax + entropy -------------------------
    m = jnp.max(logits, axis=-1, keepdims=True)
    z = logits - m
    ez = jnp.exp(z)
    sez = jnp.sum(ez, axis=-1, keepdims=True)
    logp_all = z - jnp.log(sez)                                      # (TB,A)
    p = ez * (1.0 / sez)
    entropy = -jnp.sum(p * logp_all, axis=-1, keepdims=True)         # (TB,1)

    # ---- action: argmax (deterministic) or Gumbel-max sample ----------------
    if deterministic:
        y = logits
    else:
        g = gumbel_ref[...]                                          # (TB,A)
        if inv_temp == 1.0:
            y = logits + g
        else:
            y = logits * jnp.float32(inv_temp) + g

    ymax = jnp.max(y, axis=-1, keepdims=True)
    act_iota = jax.lax.broadcasted_iota(jnp.int32, (TB, A), 1)
    action = jnp.min(jnp.where(y >= ymax, act_iota, A),
                     axis=-1, keepdims=True)                         # (TB,1) i32

    # log-prob of the chosen action under the un-tempered distribution
    log_prob = jnp.sum(jnp.where(act_iota == action, logp_all, 0.0),
                       axis=-1, keepdims=True)                       # (TB,1)

    # ---- single lane-dense packed store (implicit (TB,1) broadcasts) --------
    lane = jax.lax.broadcasted_iota(jnp.int32, (TB, OUT_LANES), 1)
    out_ref[...] = jnp.where(lane == 0, action.astype(jnp.float32),
                             jnp.where(lane == 1, log_prob,
                                       jnp.where(lane == 2, entropy, 0.0)))


def _pick_tile(b_pad):
    # >= 2 grid steps required for a tile to be worth it (v7x megacore split);
    # otherwise keep a single block.  b_pad is always a multiple of 8.
    for cand in (256, 128, 64):
        if b_pad >= 2 * cand and b_pad % cand == 0:
            return cand
    return b_pad


@functools.partial(jax.jit, static_argnames=("temperature", "deterministic"))
def actor_forward(obs, params, key, temperature=1.0, deterministic=False):
    """obs: (B,) or (B,1) int32 state indices. Returns (action, log_prob, entropy)."""
    emb, w1, b1, w2, b2, w3, b3 = params
    B = int(obs.shape[0])
    S = emb.shape[0]
    A = w3.shape[1]

    # Fold the ENTIRE MLP into one per-state logits table (exact: one-hot row
    # selection commutes with the elementwise nonlinearities).
    h = jnp.tanh(jnp.dot(emb, w1, preferred_element_type=jnp.float32) + b1)
    h = jnp.tanh(jnp.dot(h, w2, preferred_element_type=jnp.float32) + b2)
    table_logits = (jnp.dot(h, w3, preferred_element_type=jnp.float32)
                    + b3).astype(jnp.float32)                        # (S,A)

    det = bool(deterministic) or (temperature is None)
    inv_temp = 1.0 if det else float(1.0 / float(temperature))

    # Pad batch to a sublane multiple so every tile gets unmasked loads/stores.
    B_pad = ((B + 7) // 8) * 8
    TB = _pick_tile(B_pad)
    grid = (B_pad // TB,)

    obs2 = jnp.zeros((B_pad, 1), jnp.int32).at[:B, 0].set(
        obs.reshape(-1).astype(jnp.int32))
    if det:
        gumbel = jnp.zeros((B_pad, A), jnp.float32)
    else:
        gumbel = jax.random.gumbel(key, (B_pad, A), dtype=jnp.float32)

    kernel = functools.partial(_actor_kernel,
                               inv_temp=inv_temp, deterministic=det)

    slab = pl.pallas_call(
        kernel,
        out_shape=jax.ShapeDtypeStruct((B_pad, OUT_LANES), jnp.float32),
        grid_spec=pltpu.PrefetchScalarGridSpec(
            num_scalar_prefetch=0,
            grid=grid,
            in_specs=[
                pl.BlockSpec((TB, 1), lambda i: (i, 0)),     # obs indices
                pl.BlockSpec((TB, A), lambda i: (i, 0)),     # Gumbel noise
                pl.BlockSpec((S, A), lambda i: (0, 0)),      # logits table (const)
            ],
            out_specs=pl.BlockSpec((TB, OUT_LANES), lambda i: (i, 0)),
        ),
        compiler_params=pltpu.CompilerParams(
            dimension_semantics=("parallel",)),
    )(obs2, gumbel, table_logits)

    action = slab[:B, 0].astype(jnp.int32)   # exact: action < A << 2**24
    log_prob = slab[:B, 1]
    entropy = slab[:B, 2]
    return action, log_prob, entropy


def init_actor_params(key, action_dim, hidden_dim, max_states, embed_dim):
    """PyTorch-like shapes; Linear weights stored transposed as (in, out)."""
    def linear(k, fin, fout):
        kw, kb = jax.random.split(k)
        bound = 1.0 / np.sqrt(fin)
        w = jax.random.uniform(kw, (fin, fout), jnp.float32, -bound, bound)
        b = jax.random.uniform(kb, (1, fout), jnp.float32, -bound, bound)
        return w, b

    k_emb, k1, k2, k3 = jax.random.split(key, 4)
    emb = jax.random.normal(k_emb, (max_states, embed_dim), jnp.float32)
    w1, b1 = linear(k1, embed_dim, hidden_dim)
    w2, b2 = linear(k2, hidden_dim, hidden_dim)
    w3, b3 = linear(k3, hidden_dim, action_dim)
    return (emb, w1, b1, w2, b2, w3, b3)


def actor_logits_ref(obs, params):
    """Pure-JAX reference for logits / log-softmax / entropy."""
    emb, w1, b1, w2, b2, w3, b3 = params
    x = emb[obs.reshape(-1)]                    # (B,E)
    x = jnp.tanh(x @ w1 + b1)
    x = jnp.tanh(x @ w2 + b2)
    logits = x @ w3 + b3
    logp_all = jax.nn.log_softmax(logits, axis=-1)
    p = jnp.exp(logp_all)
    entropy = -jnp.sum(p * logp_all, axis=-1)
    return logits, logp_all, entropy


if __name__ == "__main__":
    # FrozenLake 4x4: 16 states, 4 actions.
    B, ACTION_DIM, HIDDEN_DIM, MAX_STATES, EMBED_DIM = 8, 4, 32, 16, 1

    key = jax.random.PRNGKey(0)
    k_param, k_obs, k_samp = jax.random.split(key, 3)

    params = init_actor_params(k_param, ACTION_DIM, HIDDEN_DIM,
                               MAX_STATES, EMBED_DIM)
    obs = jax.random.randint(k_obs, (B,), 0, MAX_STATES, dtype=jnp.int32)

    logits_ref, logp_all_ref, ent_ref = actor_logits_ref(obs, params)

    # --- stochastic path (module default: temperature=1, deterministic=False)
    action, log_prob, entropy = actor_forward(obs, params, k_samp,
                                              temperature=1.0,
                                              deterministic=False)
    jax.block_until_ready((action, log_prob, entropy))

    a_np = np.asarray(action)
    assert a_np.min() >= 0 and a_np.max() < ACTION_DIM
    np.testing.assert_allclose(np.asarray(entropy), np.asarray(ent_ref),
                               rtol=1e-5, atol=1e-5)
    np.testing.assert_allclose(
        np.asarray(log_prob),
        np.asarray(logp_all_ref)[np.arange(B), a_np],
        rtol=1e-5, atol=1e-5)

    # --- stochastic path with temperature != 1 (log_prob/entropy un-tempered)
    a_t, lp_t, ent_t = actor_forward(obs, params, k_samp,
                                     temperature=0.5, deterministic=False)
    jax.block_until_ready((a_t, lp_t, ent_t))
    a_t_np = np.asarray(a_t)
    assert a_t_np.min() >= 0 and a_t_np.max() < ACTION_DIM
    np.testing.assert_allclose(
        np.asarray(lp_t),
        np.asarray(logp_all_ref)[np.arange(B), a_t_np],
        rtol=1e-5, atol=1e-5)
    np.testing.assert_allclose(np.asarray(ent_t), np.asarray(ent_ref),
                               rtol=1e-5, atol=1e-5)

    # --- deterministic path: action must be argmax(logits) ------------------
    a_det, lp_det, ent_det = actor_forward(obs, params, k_samp,
                                           temperature=1.0, deterministic=True)
    jax.block_until_ready((a_det, lp_det, ent_det))
    assert np.array_equal(np.asarray(a_det),
                          np.asarray(jnp.argmax(logits_ref, axis=-1)))
    np.testing.assert_allclose(
        np.asarray(lp_det),
        np.asarray(logp_all_ref)[np.arange(B), np.asarray(a_det)],
        rtol=1e-5, atol=1e-5)
    np.testing.assert_allclose(np.asarray(ent_det), np.asarray(ent_ref),
                               rtol=1e-5, atol=1e-5)

    print("KERNEL_OK")
</pallas_src>

<mosaic_0001>
module attributes {stable_mosaic.version = 11 : i64} {
  func.func @_actor_kernel(%arg0: i32, %arg1: memref<8x1xi32, #tpu.memory_space<vmem>>, %arg2: memref<8x4xf32, #tpu.memory_space<vmem>>, %arg3: memref<16x4xf32, #tpu.memory_space<vmem>>, %arg4: memref<8x128xf32, #tpu.memory_space<vmem>>) attributes {dimension_semantics = [#tpu.dimension_semantics<parallel>], iteration_bounds = array<i64: 1>, scalar_prefetch = 0 : i64, scratch_operands = 0 : i64, tpu.core_type = #tpu.core_type<tc>, window_params = [{transform_indices = @transform_0, window_bounds = array<i64: 8, 1>}, {transform_indices = @transform_1, window_bounds = array<i64: 8, 4>}, {pipeline_mode = #tpu.pipeline_mode<synchronous>, transform_indices = @transform_2, window_bounds = array<i64: 16, 4>}, {transform_indices = @transform_3, window_bounds = array<i64: 8, 128>}]} {
    %c0 = arith.constant 0 : index
    %c0_0 = arith.constant 0 : index
    %0 = vector.load %arg1[%c0, %c0_0] : memref<8x1xi32, #tpu.memory_space<vmem>>, vector<8x1xi32>
    %1 = tpu.iota {dimensions = array<i32: 1>} : vector<8x16xi32>
    %2 = vector.broadcast %0 : vector<8x1xi32> to vector<8x16xi32>
    %3 = arith.cmpi eq, %1, %2 : vector<8x16xi32>
    %4 = arith.extui %3 : vector<8x16xi1> to vector<8x16xi32>
    %5 = arith.sitofp %4 : vector<8x16xi32> to vector<8x16xf32>
    %c0_1 = arith.constant 0 : index
    %c0_2 = arith.constant 0 : index
    %6 = vector.load %arg3[%c0_1, %c0_2] : memref<16x4xf32, #tpu.memory_space<vmem>>, vector<16x4xf32>
    %cst = arith.constant dense<0.000000e+00> : vector<8x4xf32>
    %7 = tpu.matmul %5, %6, %cst {dimension_numbers = #tpu.dot_dimension_numbers<[1], [0], [0], [1], [0, 0, 1, 1], [], []>} : vector<8x16xf32>, vector<16x4xf32>, vector<8x4xf32> -> vector<8x4xf32>
    %cst_3 = arith.constant dense<0xFF800000> : vector<8xf32>
    %8 = vector.multi_reduction <maximumf>, %7, %cst_3 [1] : vector<8x4xf32> to vector<8xf32>
    %9 = vector.shape_cast %8 : vector<8xf32> to vector<8x1xf32>
    %10 = vector.broadcast %9 : vector<8x1xf32> to vector<8x4xf32>
    %11 = arith.subf %7, %10 : vector<8x4xf32>
    %12 = math.exp %11 : vector<8x4xf32>
    %cst_4 = arith.constant dense<0.000000e+00> : vector<8xf32>
    %13 = vector.multi_reduction <add>, %12, %cst_4 [1] : vector<8x4xf32> to vector<8xf32>
    %14 = vector.shape_cast %13 : vector<8xf32> to vector<8x1xf32>
    %15 = math.log %14 : vector<8x1xf32>
    %16 = vector.broadcast %15 : vector<8x1xf32> to vector<8x4xf32>
    %17 = arith.subf %11, %16 : vector<8x4xf32>
    %cst_5 = arith.constant 1.000000e+00 : f32
    %18 = vector.broadcast %cst_5 : f32 to vector<8x1xf32>
    %19 = arith.divf %18, %14 : vector<8x1xf32>
    %20 = vector.broadcast %19 : vector<8x1xf32> to vector<8x4xf32>
    %21 = arith.mulf %12, %20 : vector<8x4xf32>
    %22 = arith.mulf %21, %17 : vector<8x4xf32>
    %cst_6 = arith.constant dense<0.000000e+00> : vector<8xf32>
    %23 = vector.multi_reduction <add>, %22, %cst_6 [1] : vector<8x4xf32> to vector<8xf32>
    %24 = vector.shape_cast %23 : vector<8xf32> to vector<8x1xf32>
    %cst_7 = arith.constant 0.000000e+00 : f32
    %25 = vector.broadcast %cst_7 : f32 to vector<8x1xf32>
    %26 = arith.subf %25, %24 : vector<8x1xf32>
    %c0_8 = arith.constant 0 : index
    %c0_9 = arith.constant 0 : index
    %27 = vector.load %arg2[%c0_8, %c0_9] : memref<8x4xf32, #tpu.memory_space<vmem>>, vector<8x4xf32>
    %28 = arith.addf %7, %27 : vector<8x4xf32>
    %cst_10 = arith.constant dense<0xFF800000> : vector<8xf32>
    %29 = vector.multi_reduction <maximumf>, %28, %cst_10 [1] : vector<8x4xf32> to vector<8xf32>
    %30 = vector.shape_cast %29 : vector<8xf32> to vector<8x1xf32>
    %31 = tpu.iota {dimensions = array<i32: 1>} : vector<8x4xi32>
    %32 = vector.broadcast %30 : vector<8x1xf32> to vector<8x4xf32>
    %33 = arith.cmpf oge, %28, %32 : vector<8x4xf32>
    %c4_i32 = arith.constant 4 : i32
    %34 = vector.broadcast %c4_i32 : i32 to vector<8x4xi32>
    %35 = arith.select %33, %31, %34 : vector<8x4xi1>, vector<8x4xi32>
    %cst_11 = arith.constant dense<2147483647> : vector<8xi32>
    %36 = vector.multi_reduction <minsi>, %35, %cst_11 [1] : vector<8x4xi32> to vector<8xi32>
    %37 = vector.shape_cast %36 : vector<8xi32> to vector<8x1xi32>
    %38 = vector.broadcast %37 : vector<8x1xi32> to vector<8x4xi32>
    %39 = arith.cmpi eq, %31, %38 : vector<8x4xi32>
    %cst_12 = arith.constant 0.000000e+00 : f32
    %40 = vector.broadcast %cst_12 : f32 to vector<8x4xf32>
    %41 = arith.select %39, %17, %40 : vector<8x4xi1>, vector<8x4xf32>
    %cst_13 = arith.constant dense<0.000000e+00> : vector<8xf32>
    %42 = vector.multi_reduction <add>, %41, %cst_13 [1] : vector<8x4xf32> to vector<8xf32>
    %43 = vector.shape_cast %42 : vector<8xf32> to vector<8x1xf32>
    %44 = tpu.iota {dimensions = array<i32: 1>} : vector<8x128xi32>
    %c0_i32 = arith.constant 0 : i32
    %45 = vector.broadcast %c0_i32 : i32 to vector<8x128xi32>
    %46 = arith.cmpi eq, %44, %45 : vector<8x128xi32>
    %47 = arith.sitofp %37 : vector<8x1xi32> to vector<8x1xf32>
    %c1_i32 = arith.constant 1 : i32
    %48 = vector.broadcast %c1_i32 : i32 to vector<8x128xi32>
    %49 = arith.cmpi eq, %44, %48 : vector<8x128xi32>
    %c2_i32 = arith.constant 2 : i32
    %50 = vector.broadcast %c2_i32 : i32 to vector<8x128xi32>
    %51 = arith.cmpi eq, %44, %50 : vector<8x128xi32>
    %cst_14 = arith.constant 0.000000e+00 : f32
    %52 = vector.shape_cast %26 : vector<8x1xf32> to vector<8x1xf32>
    %53 = vector.broadcast %52 : vector<8x1xf32> to vector<8x128xf32>
    %54 = vector.broadcast %cst_14 : f32 to vector<8x128xf32>
    %55 = arith.select %51, %53, %54 : vector<8x128xi1>, vector<8x128xf32>
    %56 = vector.shape_cast %43 : vector<8x1xf32> to vector<8x1xf32>
    %57 = vector.broadcast %56 : vector<8x1xf32> to vector<8x128xf32>
    %58 = arith.select %49, %57, %55 : vector<8x128xi1>, vector<8x128xf32>
    %59 = vector.shape_cast %47 : vector<8x1xf32> to vector<8x1xf32>
    %60 = vector.broadcast %59 : vector<8x1xf32> to vector<8x128xf32>
    %61 = arith.select %46, %60, %58 : vector<8x128xi1>, vector<8x128xf32>
    %c0_15 = arith.constant 0 : index
    %c0_16 = arith.constant 0 : index
    %62 = vector.load %arg4[%c0_15, %c0_16] : memref<8x128xf32, #tpu.memory_space<vmem>>, vector<8x128xf32>
    tpu.vector_store %arg4[%c0_15, %c0_16], %61 {strides = array<i32>} : memref<8x128xf32, #tpu.memory_space<vmem>>, vector<8x128xf32>,
    return
  }
  func.func @transform_0(%arg0: i32) -> (i32, i32) {
    %c0_i32 = arith.constant 0 : i32
    %c0_i32_0 = arith.constant 0 : i32
    return %arg0, %c0_i32 : i32, i32
  }
  func.func @transform_1(%arg0: i32) -> (i32, i32) {
    %c0_i32 = arith.constant 0 : i32
    %c0_i32_0 = arith.constant 0 : i32
    return %arg0, %c0_i32 : i32, i32
  }
  func.func @transform_2(%arg0: i32) -> (i32, i32) {
    %c0_i32 = arith.constant 0 : i32
    %c0_i32_0 = arith.constant 0 : i32
    %c0_i32_1 = arith.constant 0 : i32
    return %c0_i32, %c0_i32_0 : i32, i32
  }
  func.func @transform_3(%arg0: i32) -> (i32, i32) {
    %c0_i32 = arith.constant 0 : i32
    %c0_i32_0 = arith.constant 0 : i32
    return %arg0, %c0_i32 : i32, i32
  }
}

</mosaic_0001>

<bundles_post_ra>
// kernel: actor_forward.1
= control target key start
LH: loop header
LB: loop body
LE: loop exit
PB: predicated region body
PF: predicated region fallthrough
CT: control target
= control target key end

     0   :  { %v185_v0 = vmov 0   ;;  %v186_v2 = vmov 0.0|0.0   ;;  %vm187_vm0 = vmmov 0   ;;  %v188_v6 = vmov 0.0   ;;  %s238_s0 = inlined_call_operand.vmem [shape: s32[8,1], index: 0, kind: input, shape index: {}]   ;;  %s239_s2 = inlined_call_operand.vmem [shape: f32[16,4], index: 2, kind: input, shape index: {}]   ;;  %s240_s1 = inlined_call_operand.vmem [shape: f32[8,4], index: 1, kind: input, shape index: {}]   ;;  %s241_s3 = inlined_call_operand.vmem [shape: f32[8,128], index: 3, kind: output, shape index: {}]  }
   0x1   :  { %178 = vset.pattern.permute.xlu0 %v185_v0  ;;  %v14_v1 = vld [vmem:[%s238_s0] sm:$0xff]  ;;  %171 = vmatprep.subr.bf16.mxu0 %v186_v2  ;;  %v24_v4 = vld [vmem:[%s239_s2 + $0x8] sm:$0xff]  ;;  %v15_v7 = vlaneseq  ;;  %vm25_vm1 = vcmask 130048   ;;  %vm99_vm3 = vcmask 31744  }
   0x2   :  { %v23_v3 = vld [vmem:[%s239_s2] sm:$0xff]  ;;  %18 = vperm.xlu0 %178, %v14_v1   ;;  %168 = vmatprep.mubr.msk.f32.mxu0 %vm187_vm0, %v188_v6 }
   0x3   :  { %v172_v5 = vpack.c.bf16 %v24_v4, %v23_v3  ;;  %v218_v8 = vand.u32 127, %v15_v7  ;;  %v120_v11 = vld [vmem:[%s240_s1] sm:$0xff] }
   0x5   :  { %173 = vmatpush3.bf16.msra.mxu0 %v172_v5  ;;  %vm150_vm7 = vcmp.eq.s32.totalorder %v218_v8, 2  ;;  %vm149_vm8 = vcmp.eq.s32.totalorder %v218_v8, 1  ;;  %vm147_vm9 = vcmp.eq.s32.totalorder %v218_v8, 0 }
  0x81   :  { %v19_v9 = vpop.permute.xlu0 %18 }
  0x82   :  { %vm20_vm2 = vcmp.eq.s32.totalorder %v218_v8, %v19_v9 }
  0x83   :  { %v159_v10 = vsel %vm20_vm2, 1.0, %v188_v6 }
  0x84   :  { %169 = vmatmul.mubr.msk.f32.vlgmr.msra.gmra.mrb[0].mxu0 %vm25_vm1, %v159_v10 }
 0x157   :  { %v95_v12 = vpop.f32.mrb[0].mxu0 }
 0x158   :  { %v170_v13 = vpop.f32.mrb[1].mxu0  ;;  %v100_v14 = vsel %vm99_vm3, %v95_v12, -inf  ;;  %v121_v15 = vadd.f32 %v120_v11, %v95_v12 }
 0x159   :  { %101 = vmax.xlane.f32.xlu1 %v100_v14 }
 0x15a   :  { %v122_v16 = vsel %vm99_vm3, %v121_v15, -inf }
 0x15b   :  { %123 = vmax.xlane.f32.xlu0 %v122_v16 }
 0x1e6   :  { %v102_v17 = vpop.xlane.xlu1 %101 }
 0x1e7   :  { %v103_v18 = vsub.f32 %v95_v12, %v102_v17 }
 0x1e8   :  { %v124_v19 = vpop.xlane.xlu0 %123 }
 0x1e9   :  { %v104_v20 = vmul.f32 1.442695, %v103_v18  ;;  %vm125_vm4 = vcmp.ge.f32.partialorder %v121_v15, %v124_v19 }
 0x1ea   :  { %v126_v21 = vsel %vm125_vm4, %v218_v8, 4 }
 0x1eb   :  { %179 = vpow2.f32 %v104_v20  ;;  %v127_v22 = vsel %vm99_vm3, %v126_v21, 2147483647 }
 0x1ec   :  { %v129_v23 = vshra.s32 %v127_v22, 16  ;;  %v128_v27 = vand.u32 65535, %v127_v22 }
 0x1ee   :  { %v131_v24 = vcvt.s32.f32 %v129_v23  ;;  %v130_v29 = vcvt.s32.f32 %v128_v27 }
 0x1f0   :  { %132 = vmin.xlane.f32.xlu1 %v131_v24 }
 0x1f5   :  { %v180_v25 = vpop.eup %179 }
 0x1f6   :  { %v106_v26 = vsel %vm99_vm3, %v180_v25, 0.0 }
 0x1f7   :  { %107 = vadd.xlane.f32.xlu1 %v106_v26 }
 0x27d   :  { %v133_v28 = vpop.xlane.xlu1 %132 }
 0x27e   :  { %vm134_vm5 = vcmp.eq.f32.partialorder %v131_v24, %v133_v28  ;;  %v139_v39 = vcvt.f32.s32 %v133_v28 }
 0x27f   :  { %v135_v30 = vsel %vm134_vm5, %v130_v29, inf }
 0x280   :  { %136 = vmin.xlane.f32.xlu1 %v135_v30  ;;  %v140_v41 = vshll.u32 %v139_v39, 16 }
 0x284   :  { %v108_v31 = vpop.xlane.xlu1 %107 }
 0x285   :  { %181 = vlog2.f32 %v108_v31 }
 0x286   :  { %183 = vrcp.f32 %v108_v31 }
 0x28f   :  { %v182_v32 = vpop.eup %181 }
 0x290   :  { %v184_v33 = vpop.eup %183  ;;  %v110_v34 = vmul.f32 0.6931472, %v182_v32 }
 0x291   :  { %v114_v36 = vmul.f32 %v184_v33, %v180_v25 }
 0x292   :  { %v111_v35 = vsub.f32 %v103_v18, %v110_v34 }
 0x294   :  { %v115_v37 = vmul.f32 %v114_v36, %v111_v35 }
 0x296   :  { %v116_v38 = vsel %vm99_vm3, %v115_v37, 0.0 }
 0x297   :  { %117 = vadd.xlane.f32.xlu1 %v116_v38 }
 0x30d   :  { %v137_v40 = vpop.xlane.xlu1 %136 }
 0x30e   :  { %v138_v42 = vcvt.f32.s32 %v137_v40 }
 0x310   :  { %v141_v43 = vadd.s32 %v140_v41, %v138_v42 }
 0x312   :  { %vm142_vm6 = vcmp.eq.s32.totalorder %v218_v8, %v141_v43  ;;  %v148_v48 = vcvt.s32.f32 %v141_v43 }
 0x313   :  { %v143_v44 = vsel %vm142_vm6, %v111_v35, 0.0 }
 0x314   :  { %v144_v45 = vsel %vm99_vm3, %v143_v44, 0.0 }
 0x315   :  { %145 = vadd.xlane.f32.xlu1 %v144_v45 }
 0x324   :  { %v118_v46 = vpop.xlane.xlu1 %117 }
 0x325   :  { %v119_v47 = vsub.f32 0.0, %v118_v46 }
 0x327   :  { %v151_v49 = vsel %vm150_vm7, %v119_v47, 0.0 }
 0x3a2   :  { %v146_v50 = vpop.xlane.xlu1 %145 }
 0x3a3   :  { %v152_v51 = vsel %vm149_vm8, %v146_v50, %v151_v49 }
 0x3a4   :  { %v153_v52 = vsel %vm147_vm9, %v148_v48, %v152_v51 }
 0x3a5   :  { %154 = vst [vmem:[%s241_s3] sm:$0xff] %v153_v52 }

</bundles_post_ra>
